<compile_context>
chip_gen: v7x
topology: tpu7x:2x2x1
jax: 0.10.0
libtpu: 0.0.40
codegen_flags: <defaults>
</compile_context>

<pallas_src>
import functools

import jax
import jax.numpy as jnp
from jax.experimental import pallas as pl
from jax.experimental.pallas import tpu as pltpu


def _se_kernel(x_ref, w1_ref, b1_ref, w2_ref, b2_ref, o_ref, *, inv_hw):
    # x_ref block: (Bn, C, HW) in the input's native dtype.

    # AdaptiveAvgPool2d(1): sum over the spatial (lane) axis with an f32
    # accumulator, scaled by 1/HW.  No full-block f32 copy stays live.
    pooled = jnp.sum(x_ref[...], axis=2, dtype=jnp.float32) * inv_hw   # (Bn, C)

    # Conv2d(C -> S, k=1) on the pooled 1x1 map == matmul + bias.
    s = jnp.dot(pooled, w1_ref[...], preferred_element_type=jnp.float32) + b1_ref[...]

    # Swish: s * sigmoid(s)
    s = s * jax.nn.sigmoid(s)

    # Conv2d(S -> C, k=1) == matmul + bias.
    e = jnp.dot(s, w2_ref[...], preferred_element_type=jnp.float32) + b2_ref[...]

    # Gate in the native dtype (bf16 VALU on v6e/v7x; Mosaic upcasts on v5e).
    gate = jax.nn.sigmoid(e).astype(x_ref.dtype)                        # (Bn, C)

    # Re-read x in native dtype; multiply + store (broadcast over lanes).
    o_ref[...] = (x_ref[...] * gate[:, :, None]).astype(o_ref.dtype)    # (Bn, C, HW)


def _pick_batch_block(n, bytes_per_sample, target_block_bytes):
    """Largest divisor of n whose block fits the target, keeping grid_n >= 2."""
    cap = max(1, target_block_bytes // max(bytes_per_sample, 1))
    cap = min(cap, n)
    if n >= 2:
        cap = min(cap, n // 2)   # at least 2 grid steps -> feeds both v7x TCs
    cap = max(cap, 1)
    for d in range(cap, 0, -1):
        if n % d == 0:
            return d
    return 1


def se_module_pallas(x_nchw, w1, b1, w2, b2):
    """x_nchw: (N, C, H, W) in native dtype.
       w1: (S, C, 1, 1), b1: (S,), w2: (C, S, 1, 1), b2: (C,) (PyTorch conv layout)."""
    N, C, H, W = x_nchw.shape
    S = w1.shape[0]
    HW = H * W
    in_dtype = x_nchw.dtype
    itemsize = jnp.dtype(in_dtype).itemsize

    # --- Layout prep: metadata-only reshape, no pads, no copies ---------------
    x = x_nchw.reshape(N, C, HW)

    # --- Choose batch-per-block Bn (divisor of N, ~10 MiB blocks) -------------
    # NOTE: if a single sample (C*HW*itemsize) exceeds the target, Bn=1 and the
    # block is one full sample; further C/HW tiling is not needed at the sizes
    # this module is used at.
    target_block_bytes = 10 * 1024 * 1024
    bytes_per_sample = C * HW * itemsize
    Bn = _pick_batch_block(N, bytes_per_sample, target_block_bytes)
    grid_n = N // Bn

    # --- Weights as plain matmul operands (f32) -------------------------------
    w1t = w1.reshape(S, C).T.astype(jnp.float32)   # (C, S)
    b1r = b1.reshape(1, S).astype(jnp.float32)
    w2t = w2.reshape(C, S).T.astype(jnp.float32)   # (S, C)
    b2r = b2.reshape(1, C).astype(jnp.float32)

    # --- Honest VMEM budget: 2x in block + 2x out block + weights + headroom --
    block_bytes = Bn * C * HW * itemsize
    weight_bytes = (C * S + S + S * C + C) * 4
    needed = 4 * block_bytes + weight_bytes + (2 << 20)
    vmem_limit = int(min(max(needed, 16 << 20), 48 << 20))  # 48 MiB: safe on v7x's 64 MiB/TC

    cost = pl.CostEstimate(
        flops=int(4 * N * C * S + 2 * N * C * HW),
        transcendentals=int(N * (C + S)),
        bytes_accessed=int(2 * N * C * HW * itemsize + weight_bytes),
    )

    kernel = functools.partial(_se_kernel, inv_hw=1.0 / float(HW))

    out = pl.pallas_call(
        kernel,
        out_shape=jax.ShapeDtypeStruct((N, C, HW), in_dtype),
        grid_spec=pltpu.PrefetchScalarGridSpec(
            num_scalar_prefetch=0,
            grid=(grid_n,),
            in_specs=[
                pl.BlockSpec((Bn, C, HW), lambda n: (n, 0, 0)),  # x (full C, HW)
                pl.BlockSpec((C, S), lambda n: (0, 0)),          # w1^T
                pl.BlockSpec((1, S), lambda n: (0, 0)),          # b1
                pl.BlockSpec((S, C), lambda n: (0, 0)),          # w2^T
                pl.BlockSpec((1, C), lambda n: (0, 0)),          # b2
            ],
            out_specs=pl.BlockSpec((Bn, C, HW), lambda n: (n, 0, 0)),
        ),
        compiler_params=pltpu.CompilerParams(
            dimension_semantics=("parallel",),
            vmem_limit_bytes=vmem_limit,
        ),
        cost_estimate=cost,
    )(x, w1t, b1r, w2t, b2r)

    # Metadata-only reshape back to NCHW (no slicing, no HBM copy).
    return out.reshape(N, C, H, W)


def se_module_ref(x, w1, b1, w2, b2):
    # Pure-JAX reference (mirrors the PyTorch forward exactly), f32 math.
    N, C, H, W = x.shape
    S = w1.shape[0]
    xf = x.astype(jnp.float32)
    pooled = jnp.mean(xf, axis=(2, 3))                      # (N, C)
    s = pooled @ w1.reshape(S, C).T.astype(jnp.float32) + b1.astype(jnp.float32)
    s = s * jax.nn.sigmoid(s)
    e = s @ w2.reshape(C, S).T.astype(jnp.float32) + b2.astype(jnp.float32)
    return (xf * jax.nn.sigmoid(e)[:, :, None, None]).astype(x.dtype)


if __name__ == "__main__":
    # Small shapes consistent with the module: SEModule(in_=8, squeeze_ch=2)
    N, C, H, W = 2, 8, 16, 16
    S = 2

    key = jax.random.PRNGKey(0)
    kx, k1, kb1, k2, kb2 = jax.random.split(key, 5)

    x = jax.random.normal(kx, (N, C, H, W), dtype=jnp.float32)

    # Deterministic parameter init (PyTorch Conv2d-style uniform(-1/sqrt(fan_in), +)).
    bound1 = 1.0 / (C ** 0.5)
    w1 = jax.random.uniform(k1, (S, C, 1, 1), minval=-bound1, maxval=bound1, dtype=jnp.float32)
    b1 = jax.random.uniform(kb1, (S,), minval=-bound1, maxval=bound1, dtype=jnp.float32)
    bound2 = 1.0 / (S ** 0.5)
    w2 = jax.random.uniform(k2, (C, S, 1, 1), minval=-bound2, maxval=bound2, dtype=jnp.float32)
    b2 = jax.random.uniform(kb2, (C,), minval=-bound2, maxval=bound2, dtype=jnp.float32)

    out = se_module_pallas(x, w1, b1, w2, b2)
    out = jax.block_until_ready(out)

    ref = se_module_ref(x, w1, b1, w2, b2)
    assert out.shape == (N, C, H, W)
    assert jnp.allclose(out, ref, atol=1e-5, rtol=1e-5), "mismatch vs reference"

    print("KERNEL_OK")
</pallas_src>

<mosaic_0001>
module attributes {stable_mosaic.version = 11 : i64} {
  func.func @_se_kernel(%arg0: i32, %arg1: memref<1x8x256xf32, #tpu.memory_space<vmem>>, %arg2: memref<8x2xf32, #tpu.memory_space<vmem>>, %arg3: memref<1x2xf32, #tpu.memory_space<vmem>>, %arg4: memref<2x8xf32, #tpu.memory_space<vmem>>, %arg5: memref<1x8xf32, #tpu.memory_space<vmem>>, %arg6: memref<1x8x256xf32, #tpu.memory_space<vmem>>) attributes {dimension_semantics = [#tpu.dimension_semantics<parallel>], iteration_bounds = array<i64: 2>, scalar_prefetch = 0 : i64, scratch_operands = 0 : i64, tpu.core_type = #tpu.core_type<tc>, window_params = [{transform_indices = @transform_0, window_bounds = array<i64: 1, 8, 256>}, {pipeline_mode = #tpu.pipeline_mode<synchronous>, transform_indices = @transform_1, window_bounds = array<i64: 8, 2>}, {pipeline_mode = #tpu.pipeline_mode<synchronous>, transform_indices = @transform_2, window_bounds = array<i64: 1, 2>}, {pipeline_mode = #tpu.pipeline_mode<synchronous>, transform_indices = @transform_3, window_bounds = array<i64: 2, 8>}, {pipeline_mode = #tpu.pipeline_mode<synchronous>, transform_indices = @transform_4, window_bounds = array<i64: 1, 8>}, {transform_indices = @transform_5, window_bounds = array<i64: 1, 8, 256>}]} {
    %c0 = arith.constant 0 : index
    %c0_0 = arith.constant 0 : index
    %c0_1 = arith.constant 0 : index
    %0 = vector.load %arg1[%c0, %c0_0, %c0_1] : memref<1x8x256xf32, #tpu.memory_space<vmem>>, vector<1x8x256xf32>
    %cst = arith.constant dense<0.000000e+00> : vector<1x8xf32>
    %1 = vector.multi_reduction <add>, %0, %cst [2] : vector<1x8x256xf32> to vector<1x8xf32>
    %cst_2 = arith.constant 3.906250e-03 : f32
    %2 = vector.broadcast %cst_2 : f32 to vector<1x8xf32>
    %3 = arith.mulf %1, %2 : vector<1x8xf32>
    %c0_3 = arith.constant 0 : index
    %c0_4 = arith.constant 0 : index
    %4 = vector.load %arg2[%c0_3, %c0_4] : memref<8x2xf32, #tpu.memory_space<vmem>>, vector<8x2xf32>
    %cst_5 = arith.constant dense<0.000000e+00> : vector<1x2xf32>
    %5 = tpu.matmul %3, %4, %cst_5 {dimension_numbers = #tpu.dot_dimension_numbers<[1], [0], [0], [1], [0, 0, 1, 1], [], []>} : vector<1x8xf32>, vector<8x2xf32>, vector<1x2xf32> -> vector<1x2xf32>
    %c0_6 = arith.constant 0 : index
    %c0_7 = arith.constant 0 : index
    %6 = vector.load %arg3[%c0_6, %c0_7] : memref<1x2xf32, #tpu.memory_space<vmem>>, vector<1x2xf32>
    %7 = arith.addf %5, %6 : vector<1x2xf32>
    %8 = arith.negf %7 : vector<1x2xf32>
    %9 = math.exp %8 : vector<1x2xf32>
    %cst_8 = arith.constant 1.000000e+00 : f32
    %10 = vector.broadcast %cst_8 : f32 to vector<1x2xf32>
    %11 = arith.addf %10, %9 : vector<1x2xf32>
    %12 = arith.divf %10, %11 : vector<1x2xf32>
    %13 = arith.mulf %7, %12 : vector<1x2xf32>
    %c0_9 = arith.constant 0 : index
    %c0_10 = arith.constant 0 : index
    %14 = vector.load %arg4[%c0_9, %c0_10] : memref<2x8xf32, #tpu.memory_space<vmem>>, vector<2x8xf32>
    %cst_11 = arith.constant dense<0.000000e+00> : vector<1x8xf32>
    %15 = tpu.matmul %13, %14, %cst_11 {dimension_numbers = #tpu.dot_dimension_numbers<[1], [0], [0], [1], [0, 0, 1, 1], [], []>} : vector<1x2xf32>, vector<2x8xf32>, vector<1x8xf32> -> vector<1x8xf32>
    %c0_12 = arith.constant 0 : index
    %c0_13 = arith.constant 0 : index
    %16 = vector.load %arg5[%c0_12, %c0_13] : memref<1x8xf32, #tpu.memory_space<vmem>>, vector<1x8xf32>
    %17 = arith.addf %15, %16 : vector<1x8xf32>
    %18 = arith.negf %17 : vector<1x8xf32>
    %19 = math.exp %18 : vector<1x8xf32>
    %cst_14 = arith.constant 1.000000e+00 : f32
    %20 = vector.broadcast %cst_14 : f32 to vector<1x8xf32>
    %21 = arith.addf %20, %19 : vector<1x8xf32>
    %22 = arith.divf %20, %21 : vector<1x8xf32>
    %c0_15 = arith.constant 0 : index
    %c0_16 = arith.constant 0 : index
    %c0_17 = arith.constant 0 : index
    %23 = vector.load %arg1[%c0_15, %c0_16, %c0_17] : memref<1x8x256xf32, #tpu.memory_space<vmem>>, vector<1x8x256xf32>
    %24 = vector.shape_cast %22 : vector<1x8xf32> to vector<1x8x1xf32>
    %25 = vector.broadcast %24 : vector<1x8x1xf32> to vector<1x8x256xf32>
    %26 = arith.mulf %23, %25 : vector<1x8x256xf32>
    %c0_18 = arith.constant 0 : index
    %c0_19 = arith.constant 0 : index
    %c0_20 = arith.constant 0 : index
    %27 = vector.load %arg6[%c0_18, %c0_19, %c0_20] : memref<1x8x256xf32, #tpu.memory_space<vmem>>, vector<1x8x256xf32>
    tpu.vector_store %arg6[%c0_18, %c0_19, %c0_20], %26 {strides = array<i32>} : memref<1x8x256xf32, #tpu.memory_space<vmem>>, vector<1x8x256xf32>,
    return
  }
  func.func @transform_0(%arg0: i32) -> (i32, i32, i32) {
    %c0_i32 = arith.constant 0 : i32
    %c0_i32_0 = arith.constant 0 : i32
    %c0_i32_1 = arith.constant 0 : i32
    return %arg0, %c0_i32, %c0_i32_0 : i32, i32, i32
  }
  func.func @transform_1(%arg0: i32) -> (i32, i32) {
    %c0_i32 = arith.constant 0 : i32
    %c0_i32_0 = arith.constant 0 : i32
    %c0_i32_1 = arith.constant 0 : i32
    return %c0_i32, %c0_i32_0 : i32, i32
  }
  func.func @transform_2(%arg0: i32) -> (i32, i32) {
    %c0_i32 = arith.constant 0 : i32
    %c0_i32_0 = arith.constant 0 : i32
    %c0_i32_1 = arith.constant 0 : i32
    return %c0_i32, %c0_i32_0 : i32, i32
  }
  func.func @transform_3(%arg0: i32) -> (i32, i32) {
    %c0_i32 = arith.constant 0 : i32
    %c0_i32_0 = arith.constant 0 : i32
    %c0_i32_1 = arith.constant 0 : i32
    return %c0_i32, %c0_i32_0 : i32, i32
  }
  func.func @transform_4(%arg0: i32) -> (i32, i32) {
    %c0_i32 = arith.constant 0 : i32
    %c0_i32_0 = arith.constant 0 : i32
    %c0_i32_1 = arith.constant 0 : i32
    return %c0_i32, %c0_i32_0 : i32, i32
  }
  func.func @transform_5(%arg0: i32) -> (i32, i32, i32) {
    %c0_i32 = arith.constant 0 : i32
    %c0_i32_0 = arith.constant 0 : i32
    %c0_i32_1 = arith.constant 0 : i32
    return %arg0, %c0_i32, %c0_i32_0 : i32, i32, i32
  }
}

</mosaic_0001>

<bundles_post_ra>
// kernel: tpu_custom_call.1
= control target key start
LH: loop header
LB: loop body
LE: loop exit
PB: predicated region body
PF: predicated region fallthrough
CT: control target
= control target key end

     0   :  { %10 = vsyncpa [#allocation3], 0  ;;  %s918_s0 = inlined_call_operand.hbm [shape: f32[2,8,256], index: 0, kind: input, shape index: {}]   ;;  %s919_s1 = inlined_call_operand.vmem [shape: f32[8,2], index: 1, kind: input, shape index: {}]   ;;  %s920_s2 = inlined_call_operand.vmem [shape: f32[1,2], index: 2, kind: input, shape index: {}]   ;;  %s921_s3 = inlined_call_operand.vmem [shape: f32[2,8], index: 3, kind: input, shape index: {}]   ;;  %s922_s4 = inlined_call_operand.vmem [shape: f32[1,8], index: 4, kind: input, shape index: {}]   ;;  %s923_s5 = inlined_call_operand.hbm [shape: f32[2,8,256], index: 5, kind: output, shape index: {}]  }
   0x1   :  { %12 = vsyncpa [#allocation3 + $0x1], 0 }
   0x2   :  { %13 = vsyncpa [#allocation4], 0 }
   0x3   :  { %15 = vsyncpa [#allocation4 + $0x1], 0  ;;  %s741_s18 = smov 0   ;;  %s743_s19 = smov 0  }
   0x4   :  { %s745_s20 = smov 0   ;;  %s747_s21 = smov 0  }
   0x5 LB: > { %s762_s22 = sadd.s32 4294967295, %s705_s21   ;;  %s518_s23 = sadd.s32 4294967294, %s705_s21   ;;  %s705_s21 = sphi %s747_s21, %s938_s21   ;;  %s701_s20 = sphi %s745_s20, %s937_s20   ;;  %s697_s19 = sphi %s743_s19, %s936_s19   ;;  %s693_s18 = sphi %s741_s18, %s935_s18  }
   0x6   : > { %s766_s24 = sadd.s32 1, %s705_s21   ;;  %s28_s25 = sadd.s32 1, %s701_s20 }
   0x7   : > { %s25_s26 = ssub.s32 %s705_s21, %s766_s24  ;;  %p35_p0 = scmp.ne.s32.totalorder %s701_s20, %s697_s19 }
   0x8   : > { %p26_p1 = scmp.eq.s32.totalorder %s25_s26, 0  ;;  %p36_p2 = scmp.eq.s32.totalorder %s705_s21, 0 }
   0x9   : > { %p41_p3 = scmp.ne.s32.totalorder %s697_s19, %s693_s18  ;;  %p42_p4 = scmp.eq.s32.totalorder %s762_s22, 0 }
   0xa   : > { %s778_s27 = scalar_select %p26_p1, %s701_s20, %s28_s25  }
   0xb   : > { %p780_p5 = por %p36_p2, %p35_p0  ;;  %p784_p6 = por %p42_p4, %p41_p3 }
   0xc   : > { %p149_p7 = scmp.eq.s32.totalorder %s762_s22, 1  ;;  %p155_p8 = scmp.eq.s32.totalorder %s518_s23, 1 }
   0xd   : > { %p565_p10 = scmp.lt.s32.totalorder %s705_s21, 2  ;;  %s187_s7 = sand.u32 1, %s701_s20  }
   0xe   : > { %p791_p11 = por %p149_p7, %p35_p0  ;;  %p795_p12 = por %p155_p8, %p41_p3 }
   0xf   : > { %s537_s8 = sshll.u32 %s705_s21, 8  ;;  %s521_s9 = sshll.u32 %s187_s7, 4 }
  0x10   : > { %s927_s30 = scalar_select %p791_p11, 1, 0 }
  0x11   : > { %s928_s6 = scalar_select %p795_p12, 1, 0 }
  0x12   : > { %s804_s12 = scalar_lea.hbm %s918_s0, %s537_s8  ;;  %s191_s13 = scalar_lea.vmem [#allocation2], %s521_s9 }
  0x13   : > { %s199_s14 = sshll.u32 %s191_s13, 4  ;;  %p808_p13 = pnand %p565_p10, %p780_p5  ;;  %s812_s14 = int_to_ptr.vmem [resolvable:$true] %s199_s14 }
  0x14   : > { %s188_s16 = scalar_lea.sflag [#allocation3], %s187_s7  ;;  %s609_s17 = scalar_lea.hbm %s804_s12, 256 }
  0x15   : > { %p610_p2 = scmp.ne.s32.totalorder %s804_s12, %s609_s17  ;;  %p611_p3 = pneg %p808_p13 }
  0x16   : > { %s614_s26 = scalar_lea.hbm %s918_s0, 512  ;;  %p615_p5 = scmp.lt.u32.totalorder %s804_s12, %s918_s0 }
  0x17   : > { %p612_p4 = pnand %p611_p3, %p610_p2  ;;  %p616_p8 = scmp.lt.u32.totalorder %s614_s26, %s609_s17 }
  0x18   : > { %p618_p9 = scmp.lt.u32.totalorder %s609_s17, %s804_s12 }
  0x19   : > { %p613_p7 = pneg %p612_p4  ;;  %p617_p10 = por %p616_p8, %p615_p5 }
  0x1b   : > { %p619_p0 = por %p618_p9, %p617_p10 }
  0x1d   : > { %p620_p1 = pnand %p619_p0, %p613_p7 }
  0x1f   : > { %623 = shalt.err (!%p620_p1)
}
  0x20   : > { %s624_s7 = scalar_lea.vmem %s812_s14, 256  ;;  %s707_s9 = smov [#allocation2]  }
  0x21   : > { %p625_p2 = scmp.ne.s32.totalorder %s812_s14, %s624_s7  ;;  %s629_s10 = sshll.u32 %s707_s9, 4  ;;  %s630_s10 = int_to_ptr.vmem [resolvable:$false] %s629_s10 }
  0x22   : > { %s631_s11 = scalar_lea.vmem %s630_s10, 512  ;;  %p632_p11 = scmp.lt.s32.totalorder %s812_s14, %s630_s10 }
  0x23   : > { %p627_p4 = pnand %p625_p2, %p611_p3  ;;  %p633_p5 = scmp.lt.s32.totalorder %s631_s11, %s624_s7 }
  0x25   : > { %p628_p12 = pneg %p627_p4  ;;  %p634_p8 = por %p633_p5, %p632_p11 }
  0x27   : > { %p635_p9 = pnand %p634_p8, %p628_p12 }
  0x29   : > { %638 = shalt.err (!%p635_p9)
}
  0x2a   : > { %560 = dma.hbm_to_vmem [thread:$0]  (!%p808_p13), %s804_s12, 256, %s812_s14, %s188_s16  }
  0x2b   : > { %p930_p0 = scmp.lt.s32.totalorder %s705_s21, 3  ;;  %p931_p1 = scmp.ge.s32.totalorder %s705_s21, 1 }
  0x2d   : > { %p205_p3 = pnand %p931_p1, %p930_p0 }
  0x2e   : > { %s846_s13 = sand.u32 (!%p205_p3), 1, %s697_s19  }
  0x2f   : > { %208 = sbr.rel (%p205_p3) target bundleno = 819 (0x333), region = 40  ;;  %s525_s17 = sshll.u32 (!%p205_p3), %s846_s13, 4 }
  0x30   : > { %s211_s23 = scalar_lea.sflag (!%p205_p3), [#allocation3], %s846_s13  ;;  %s214_s15 = scalar_lea.vmem (!%p205_p3), [#allocation2], %s525_s17 }
  0x36   : > { %684 = dma.done.wait (%p784_p6), %s211_s23, 256  }
  0x37   : > { %686 = vsyncadd (%p784_p6), %s211_s23, 4294967040  ;;  %v241_v0 = vld [vmem:[%s214_s15] sm:$0xff]  ;;  %v242_v1 = vld [vmem:[%s214_s15 + $0x8] sm:$0xff]  ;;  %v708_v3 = vmov 0.0   ;;  %vm709_vm0 = vmmov 0   ;;  %v250_v5 = vlaneseq  ;;  %vm256_vm1 = vcmask 64512  }
  0x38   : > { %v243_v2 = vadd.f32 %v242_v1, %v241_v0  ;;  %543 = vmatprep.subr.mxu0 %v708_v3  ;;  %v247_v4 = vld [vmem:[%s919_s1] sm:$0xff]  ;;  %548 = vmatprep.subr.mxu1 %v708_v3  ;;  %vm342_vm2 = vcmask 1041408   ;;  %vm338_vm3 = vcmask 15360   ;;  %s538_s7 = sshll.u32 %s762_s22, 8  ;;  %s240_s9 = scalar_lea.vmem [#allocation5], %s525_s17 }
  0x39   : > { %544 = vmatpush3.msra.mxu0 %v247_v4  ;;  %545 = vmatprep.mubr.msk.f32.mxu0 %vm709_vm0, %v708_v3  ;;  %v251_v6 = vand.u32 127, %v250_v5  ;;  %v253_v7 = vshrl.u32 %v250_v5, 7  ;;  %v336_v12 = vld [vmem:[%s921_s3] sm:$0x3]  ;;  %s448_s10 = sshll.u32 %s240_s9, 4  ;;  %s874_s15 = scalar_lea.hbm %s923_s5, %s538_s7  ;;  %s876_s10 = int_to_ptr.vmem [resolvable:$true] %s448_s10 }
  0x3a   : > { %244 = vadd.xlane.f32.xlu0 %v243_v2  ;;  %550 = vmatprep.mubr.msk.f32.mxu1 %vm709_vm0, %v708_v3  ;;  %v248_v13 = vld [vmem:[%s920_s2] sm:$0x1]  ;;  %s434_s12 = scalar_lea.sflag [#allocation4], %s846_s13  ;;  %s639_s22 = scalar_lea.vmem %s876_s10, 256 }
  0x3b   : > { %v254_v8 = vsub.s32 %v251_v6, %v253_v7  ;;  %549 = vmatpush3.msk.msra.mxu1 %vm342_vm2, %v336_v12  ;;  %v337_v22 = vld [vmem:[%s922_s4] sm:$0x1]  ;;  %v424_v29 = vsub.s32 0, %v253_v7  ;;  %p640_p6 = scmp.ne.s32.totalorder %s876_s10, %s639_s22  ;;  %p932_p11 = scmp.ne.s32.totalorder %s927_s30, 0 }
  0x3c   : > { %s710_s17 = smov [#allocation5]  }
  0x3d   : > { %p641_p12 = pnand %p640_p6, %p932_p11  ;;  %s643_s14 = sshll.u32 %s710_s17, 4  ;;  %s644_s14 = int_to_ptr.vmem [resolvable:$false] %s643_s14 }
  0x3e   : > { %s645_s29 = scalar_lea.vmem %s644_s14, 512  ;;  %p646_p7 = scmp.lt.s32.totalorder %s876_s10, %s644_s14 }
  0x3f   : > { %p642_p13 = pneg %p641_p12  ;;  %p647_p10 = scmp.lt.s32.totalorder %s645_s29, %s639_s22 }
  0x41   : > { %p648_p2 = por %p647_p10, %p646_p7 }
  0x43   : > { %p649_p4 = pnand %p648_p2, %p642_p13 }
  0xc7   : > { %v245_v9 = vpop.xlane.xlu0 %244 }
  0xc8   : > { %v246_v10 = vmul.f32 0.00390625, %v245_v9 }
  0xca   : > { %v255_v11 = vrot.slane %v246_v10, %v254_v8 }
  0xcc   : > { %546 = vmatmul.mubr.msk.f32.vlgmr.msra.gmra.mrb[0].mxu0 %vm256_vm1, %v255_v11 }
 0x19f   : > { %v325_v14 = vpop.f32.mrb[0].mxu0 }
 0x1a0   : > { %v326_v15 = vadd.f32 %v325_v14, %v248_v13  ;;  %v547_v16 = vpop.f32.mrb[1].mxu0 }
 0x1a2   : > { %v528_v17 = vmul.f32 -1.442695, %v326_v15 }
 0x1a4   : > { %601 = vpow2.f32 %v528_v17 }
 0x1ae   : > { %v602_v18 = vpop.eup %601 }
 0x1af   : > { %v332_v19 = vadd.f32 1.0, %v602_v18 }
 0x1b1   : > { %603 = vrcp.f32 %v332_v19 }
 0x1bb   : > { %v604_v20 = vpop.eup %603 }
 0x1bc   : > { %v335_v21 = vmul.f32 %v604_v20, %v326_v15 }
 0x1be   : > { %551 = vmatmul.mubr.msk.f32.vlgmr.msra.gmra.mrb[0].mxu1 %vm338_vm3, %v335_v21 }
 0x291   : > { %v412_v23 = vpop.f32.mrb[0].mxu1 }
 0x292   : > { %v413_v24 = vadd.f32 %v412_v23, %v337_v22  ;;  %v552_v25 = vpop.f32.mrb[1].mxu1 }
 0x294   : > { %v531_v26 = vmul.f32 -1.442695, %v413_v24 }
 0x296   : > { %605 = vpow2.f32 %v531_v26 }
 0x2a0   : > { %v606_v27 = vpop.eup %605 }
 0x2a1   : > { %v419_v28 = vadd.f32 1.0, %v606_v27 }
 0x2a3   : > { %607 = vrcp.f32 %v419_v28 }
 0x2ad   : > { %v608_v30 = vpop.eup %607 }
 0x2ae   : > { %v425_v31 = vrot.slane %v608_v30, %v424_v29 }
 0x2b0   : > { %427 = vbcast.lane.b32.xlu0 %v425_v31, 256 }
 0x322   : > { %v428_v32 = vpop.permute.xlu0 %427 }
 0x323   : > { %v429_v33 = vmul.f32 %v428_v32, %v241_v0  ;;  %v430_v34 = vmul.f32 %v428_v32, %v242_v1 }
 0x325   : > { %431 = vst [vmem:[%s240_s9] sm:$0xff] %v429_v33  ;;  %432 = vst [vmem:[%s240_s9 + $0x8] sm:$0xff] %v430_v34 }
 0x326   : > { %652 = shalt.err (!%p649_p4)
}
 0x327   : > { %s653_s13 = scalar_lea.hbm %s874_s15, 256  ;;  %s657_s26 = scalar_lea.hbm %s923_s5, 512 }
 0x328   : > { %p654_p5 = scmp.ne.s32.totalorder %s874_s15, %s653_s13  ;;  %p658_p0 = scmp.lt.u32.totalorder %s874_s15, %s923_s5 }
 0x329   : > { %p659_p1 = scmp.lt.u32.totalorder %s657_s26, %s653_s13  ;;  %p661_p6 = scmp.lt.u32.totalorder %s653_s13, %s874_s15 }
 0x32a   : > { %p655_p8 = pnand %p654_p5, %p932_p11 }
 0x32b   : > { %p660_p3 = por %p659_p1, %p658_p0 }
 0x32c   : > { %p656_p9 = pneg %p655_p8 }
 0x32d   : > { %p662_p12 = por %p661_p6, %p660_p3 }
 0x32f   : > { %p663_p13 = pnand %p662_p12, %p656_p9 }
 0x331   : > { %666 = shalt.err (!%p663_p13)
}
 0x332   : > { %555 = dma.vmem_to_hbm [thread:$0]  (%p932_p11), %s876_s10, 256, %s874_s15, %s434_s12  }
 0x333 PF: > { %s460_s7 = sand.u32 1, %s693_s18   ;;  %p933_p7 = scmp.ne.s32.totalorder %s928_s6, 0 }
 0x334   : > { %p934_p10 = scmp.ge.s32.totalorder %s705_s21, 2  ;;  %s461_s9 = scalar_lea.sflag [#allocation4], %s460_s7 }
 0x336   : > { %p562_p2 = pnand %p934_p10, %p933_p7 }
 0x338   : > { %688 = dma.done.wait (!%p562_p2), %s461_s9, 256  }
 0x339   : > { %690 = vsyncadd (!%p562_p2), %s461_s9, 4294967040  ;;  %p18_p4 = scmp.ge.s32.totalorder %s766_s24, 4   ;;  %s935_s18 = smov %s697_s19 }
 0x33a   : > { %s936_s19 = smov %s701_s20  ;;  %s937_s20 = smov %s778_s27 }
 0x33b   : > { %s938_s21 = smov %s766_s24  ;;  %20 = sbr.rel (!%p18_p4) target bundleno = 5 (0x5), region = 85 }
 0x342   :  { %466 = vsyncpa [#allocation3], 1 }
 0x343   :  { %468 = vsyncpa [#allocation3 + $0x1], 1 }
 0x344   :  { %469 = vsyncpa [#allocation4], 1 }
 0x345   :  { %471 = vsyncpa [#allocation4 + $0x1], 1 }

</bundles_post_ra>
